<compile_context>
chip_gen: v5e
topology: v5e:2x2
jax: 0.10.0
libtpu: 0.0.40
codegen_flags: <defaults>
</compile_context>

<pallas_src>
import functools

import jax
import jax.numpy as jnp
from jax.experimental import pallas as pl
from jax.experimental.pallas import tpu as pltpu

_LANES = 128
_CHUNK_ROWS = 1024                      # rows per in-kernel accumulation chunk
_TARGET_BLOCK_BYTES = 4 * 1024 * 1024   # ~4 MiB streaming tile per input
_VMEM_LIMIT_BYTES = 32 * 1024 * 1024    # explicit scoped-VMEM limit


def _round_up(x, m):
    return ((x + m - 1) // m) * m


def _sublane_packing(dtype):
    # Native sublane packing: 8 for 4-byte, 16 for 2-byte, 32 for 1-byte dtypes.
    return max(1, 4 // jnp.dtype(dtype).itemsize) * 8


def _default_num_splits():
    # 2 only when the device reports a multi-TensorCore (megacore) chip,
    # otherwise 1 (v5e / v6e): avoids the index clamp and dummy masked blocks.
    try:
        n = int(getattr(jax.devices()[0], "num_cores", 1) or 1)
    except Exception:
        n = 1
    return 2 if n >= 2 else 1


# ---------------------------------------------------------------------------
# Pallas kernel: streaming sum of squared differences (partial reduction)
# ---------------------------------------------------------------------------
def _sq_diff_sum_kernel(x_ref, y_ref, o_ref, acc_ref, *, tile_rows, chunk_rows,
                        valid_rows, blocks_per_split, needs_mask, unroll):
    s = pl.program_id(0)      # split (maps to TensorCores when core-parallel)
    j = pl.program_id(1)      # reduction step within the split ("arbitrary")

    @pl.when(j == 0)
    def _():
        acc_ref[...] = jnp.zeros_like(acc_ref)

    block_row0 = (s * blocks_per_split + j) * tile_rows
    n_chunks = tile_rows // chunk_rows

    def accumulate(apply_mask):
        def body(c, carry):
            start = c * chunk_rows
            if not isinstance(start, int):
                start = pl.multiple_of(start, chunk_rows)
            xc = x_ref[pl.ds(start, chunk_rows), :].astype(jnp.float32)
            yc = y_ref[pl.ds(start, chunk_rows), :].astype(jnp.float32)
            d = xc - yc
            dd = d * d
            if apply_mask:
                # Zero rows past the end of the (rows, 128) bulk slab: covers
                # both the partial last block and fully-dummy clamped blocks.
                row_ids = (block_row0 + start) + jax.lax.broadcasted_iota(
                    jnp.int32, dd.shape, 0)
                dd = jnp.where(row_ids < valid_rows, dd, 0.0)
            # VPU-only partial reduce onto a vreg-shaped (8, 128) accumulator.
            acc_ref[...] += jnp.sum(
                dd.reshape(chunk_rows // 8, 8, _LANES), axis=0)
            return carry

        if n_chunks == 1:
            body(0, 0)
        else:
            jax.lax.fori_loop(0, n_chunks, body, 0, unroll=unroll)

    if needs_mask:
        is_boundary = block_row0 + tile_rows > valid_rows

        @pl.when(is_boundary)
        def _():
            accumulate(True)

        @pl.when(jnp.logical_not(is_boundary))
        def _():
            accumulate(False)
    else:
        accumulate(False)

    @pl.when(j == pl.num_programs(1) - 1)
    def _():
        # Lane-dense partial-sum slab per split; tiny final sum on the host.
        o_ref[...] = acc_ref[...]


# ---------------------------------------------------------------------------
# Builder: one jitted loss fn per (shape, dtype, config), cached
# ---------------------------------------------------------------------------
@functools.lru_cache(maxsize=None)
def _build_scaled_mse(shape, pred_dtype, target_dtype, min_pallas_elems,
                      max_tile_rows, num_splits, core_parallel):
    total = 1
    for d in shape:
        total *= int(d)

    if total == 0:
        return lambda pred, target, scale: jnp.float32(0.0)

    rows = total // _LANES

    # Small-input fast path: a fused XLA reduce is already at roofline and
    # avoids the pallas_call fixed cost.
    if total < min_pallas_elems or rows == 0:
        @jax.jit
        def jax_fn(pred, target, scale):
            d = pred.astype(jnp.float32) - target.astype(jnp.float32)
            return jnp.sum(d * d) * (jnp.float32(scale) / jnp.float32(total))
        return jax_fn

    itemsize = max(jnp.dtype(pred_dtype).itemsize,
                   jnp.dtype(target_dtype).itemsize)
    packing = max(_sublane_packing(pred_dtype), _sublane_packing(target_dtype))

    # ~4 MiB per input per grid step: hides the ~0.35us per-step overhead even
    # at v7x HBM speed; 2 inputs x 2 buffers (~16 MiB) + chunk temporaries fit
    # the explicit 32 MiB VMEM limit on every generation.
    max_rows = max(_CHUNK_ROWS,
                   (_TARGET_BLOCK_BYTES // (_LANES * itemsize))
                   // _CHUNK_ROWS * _CHUNK_ROWS)
    if rows <= _CHUNK_ROWS:
        tile_rows = _round_up(rows, packing)
    else:
        tile_rows = min(max_rows, _round_up(rows, _CHUNK_ROWS))
    if max_tile_rows is not None:
        tile_rows = min(tile_rows,
                        max(packing, (max_tile_rows // packing) * packing))

    if tile_rows > _CHUNK_ROWS and tile_rows % _CHUNK_ROWS == 0:
        chunk_rows = _CHUNK_ROWS
    else:
        chunk_rows = tile_rows
    n_chunks = tile_rows // chunk_rows

    blocks_total = -(-rows // tile_rows)
    num_splits = max(1, min(int(num_splits), blocks_total))
    blocks_per_split = -(-blocks_total // num_splits)
    needs_mask = (num_splits * blocks_per_split * tile_rows) != rows
    needs_clamp = (num_splits * blocks_per_split) > blocks_total

    if needs_clamp:
        def in_map(s, j):
            return (jnp.minimum(s * blocks_per_split + j, blocks_total - 1), 0)
    else:
        def in_map(s, j):
            return (s * blocks_per_split + j, 0)

    # CORE_PARALLEL guarantees the split axis is sharded across TensorCores on
    # multi-TC chips (v7x); plain "parallel" is the safe default elsewhere.
    if core_parallel and num_splits > 1:
        split_sem = pltpu.CORE_PARALLEL
    else:
        split_sem = "parallel"

    kernel = functools.partial(
        _sq_diff_sum_kernel,
        tile_rows=tile_rows, chunk_rows=chunk_rows, valid_rows=rows,
        blocks_per_split=blocks_per_split, needs_mask=needs_mask,
        unroll=n_chunks <= 8)

    pallas_fn = pl.pallas_call(
        kernel,
        out_shape=jax.ShapeDtypeStruct((num_splits * 8, _LANES), jnp.float32),
        grid_spec=pltpu.PrefetchScalarGridSpec(
            num_scalar_prefetch=0,
            grid=(num_splits, blocks_per_split),
            in_specs=[pl.BlockSpec((tile_rows, _LANES), in_map),
                      pl.BlockSpec((tile_rows, _LANES), in_map)],
            out_specs=pl.BlockSpec((8, _LANES), lambda s, j: (s, 0)),
            scratch_shapes=[pltpu.VMEM((8, _LANES), jnp.float32)]),
        compiler_params=pltpu.CompilerParams(
            dimension_semantics=(split_sem, "arbitrary"),
            vmem_limit_bytes=_VMEM_LIMIT_BYTES),
        cost_estimate=pl.CostEstimate(
            flops=3 * rows * _LANES,
            transcendentals=0,
            bytes_accessed=2 * rows * _LANES * itemsize
                           + num_splits * 8 * _LANES * 4),
    )

    bulk = rows * _LANES
    tail = total - bulk
    inv_total = 1.0 / float(total)

    @jax.jit
    def loss_fn(pred, target, scale):
        if tail:
            x = pred.reshape(-1)
            y = target.reshape(-1)
            # TODO(synk): XLA may still materialize the bulk slice below when
            # it feeds the pallas_call; unlike the old jnp.pad path there is
            # no extra zero-fill write, and aligned totals (the common case)
            # go through the copy-free branch.
            xb = x[:bulk].reshape(rows, _LANES)
            yb = y[:bulk].reshape(rows, _LANES)
            dt = x[bulk:].astype(jnp.float32) - y[bulk:].astype(jnp.float32)
            tail_sum = jnp.sum(dt * dt)
        else:
            xb = pred.reshape(rows, _LANES)
            yb = target.reshape(rows, _LANES)
            tail_sum = jnp.float32(0.0)
        partials = pallas_fn(xb, yb)
        # One tiny cross-lane reduce of the partial slabs + one scalar scale.
        return (jnp.sum(partials) + tail_sum) * (jnp.float32(scale) * inv_total)

    return loss_fn


def wrapped_mse_loss(pred, target, scale, *, min_pallas_elems=1 << 20,
                     max_tile_rows=None, num_splits=None, core_parallel=False):
    """Scaled MSE: mean((pred - target)^2) * scale.

    Large inputs stream through a Pallas TPU kernel; on v7x pass
    num_splits=2, core_parallel=True to shard the stream across both
    TensorCores.
    """
    assert pred.shape == target.shape, (pred.shape, target.shape)
    if num_splits is None:
        num_splits = _default_num_splits()
    fn = _build_scaled_mse(
        tuple(int(d) for d in pred.shape),
        str(jnp.dtype(pred.dtype)), str(jnp.dtype(target.dtype)),
        int(min_pallas_elems),
        None if max_tile_rows is None else int(max_tile_rows),
        int(num_splits), bool(core_parallel))
    return fn(pred, target, scale)


# ---------------------------------------------------------------------------
# Warmup tweening (pytweening.easeInExpo equivalent)
# ---------------------------------------------------------------------------
def _ease_in_expo(t):
    # pytweening.easeInExpo: 0 at t==0, else 2 ** (10 * (t - 1))
    return 0.0 if t <= 0.0 else 2.0 ** (10.0 * (t - 1.0))


# ---------------------------------------------------------------------------
# LossWrapper (forward-pass semantics of the PyTorch module)
# ---------------------------------------------------------------------------
class LossWrapper:
    def __init__(self, loss, weight=1.0, warmup_num_steps=None,
                 warmup_method="easeInExpo", inverse=False):
        # TODO(synk): only the 'easeInExpo' pytweening method is implemented.
        if weight <= 0:
            self.loss = lambda *args, **kwargs: 0
        else:
            self.loss = loss
        self.weight = weight
        self.warmup_num_steps = warmup_num_steps
        self.warmup_method = warmup_method
        self.inverse = inverse
        self.num_steps = 0  # buffer `num_steps` (long scalar) -> python int
        self.training = True
        self._has_interpolator = (warmup_num_steps is not None
                                  and warmup_num_steps > 0)

    def __call__(self, *args, **kwargs):
        warmup_weight = 1.0
        if self.training and self._has_interpolator:
            t = min(self.num_steps / float(self.warmup_num_steps), 1.0)
            w = _ease_in_expo(t)
            warmup_weight = (1.0 - w) if self.inverse else w
            self.num_steps += 1
        if self.weight > 0:
            scale = float(self.weight) * float(warmup_weight)
            loss = self.loss(*args, scale=scale, **kwargs)
            if isinstance(loss, (tuple, list)):
                loss, *out_values = loss
                return (loss, *out_values)
            return loss
        return 0

    def denorm_loss(self, loss_value):
        if self.weight > 0:
            return loss_value / self.weight
        return 0


# ---------------------------------------------------------------------------
# Demo / self-test
# ---------------------------------------------------------------------------
if __name__ == "__main__":
    key = jax.random.PRNGKey(0)
    ks = jax.random.split(key, 8)

    # NCHW inputs: batch=2, channels=4, spatial=16x16  (2048 elems)
    pred = jax.random.normal(ks[0], (2, 4, 16, 16), dtype=jnp.float32)
    target = jax.random.normal(ks[1], (2, 4, 16, 16), dtype=jnp.float32)

    # Force the Pallas path for these small demo shapes (the default
    # threshold routes <1M-element tensors to the plain-XLA fast path).
    pallas_mse = functools.partial(wrapped_mse_loss, min_pallas_elems=0)

    wrapper = LossWrapper(pallas_mse, weight=2.0, warmup_num_steps=4,
                          warmup_method="easeInExpo", inverse=False)
    results = [wrapper(pred, target) for _ in range(3)]
    jax.block_until_ready(results)

    # Step 2 -> t = 2/4 = 0.5 -> warmup = 2**(10*(0.5-1)).
    ref_scale = 2.0 * (2.0 ** (10.0 * (0.5 - 1.0)))
    ref = jnp.mean((pred - target) ** 2) * ref_scale
    assert jnp.allclose(results[2], ref, rtol=1e-5, atol=1e-6), (results[2], ref)
    # Step 0: easeInExpo(0) == 0 -> loss scaled to exactly 0.
    assert jnp.allclose(results[0], 0.0, atol=1e-7)

    # Multi-block grid + row-tail boundary masking (20 rows, 8-row tiles).
    p2 = jax.random.normal(ks[2], (2, 5, 16, 16), dtype=jnp.float32)
    t2 = jax.random.normal(ks[3], (2, 5, 16, 16), dtype=jnp.float32)
    ref2 = jnp.mean((p2 - t2) ** 2) * 1.7
    got2 = wrapped_mse_loss(p2, t2, 1.7, min_pallas_elems=0, max_tile_rows=8)
    assert jnp.allclose(got2, ref2, rtol=1e-5, atol=1e-6), (got2, ref2)
    # Same, with an explicit 2-way split axis (clamped dummy block fully masked).
    got2b = wrapped_mse_loss(p2, t2, 1.7, min_pallas_elems=0, max_tile_rows=8,
                             num_splits=2)
    assert jnp.allclose(got2b, ref2, rtol=1e-5, atol=1e-6), (got2b, ref2)

    # Total not a multiple of 128: bulk rows through the kernel, <128-element
    # tail folded in with a tiny JAX sum (no full-array padding copy).
    p3 = jax.random.normal(ks[4], (2, 3, 15, 15), dtype=jnp.float32)
    t3 = jax.random.normal(ks[5], (2, 3, 15, 15), dtype=jnp.float32)
    got3 = wrapped_mse_loss(p3, t3, 0.5, min_pallas_elems=0)
    ref3 = jnp.mean((p3 - t3) ** 2) * 0.5
    assert jnp.allclose(got3, ref3, rtol=1e-5, atol=1e-6), (got3, ref3)

    # bf16 inputs stream at half the HBM traffic (16-row sublane packing).
    pb = pred.astype(jnp.bfloat16)
    tb = target.astype(jnp.bfloat16)
    got4 = wrapped_mse_loss(pb, tb, 1.0, min_pallas_elems=0)
    ref4 = jnp.mean((pb.astype(jnp.float32) - tb.astype(jnp.float32)) ** 2)
    assert jnp.allclose(got4, ref4, rtol=1e-4, atol=1e-5), (got4, ref4)

    # Streaming path: two 2048-row blocks, chunked in-kernel accumulation
    # (n_chunks=2), mask-free fast path on the full block + masked boundary.
    p5 = jax.random.normal(ks[6], (8, 8, 64, 80), dtype=jnp.float32)
    t5 = jax.random.normal(ks[7], (8, 8, 64, 80), dtype=jnp.float32)
    got5 = wrapped_mse_loss(p5, t5, 1.25, min_pallas_elems=0,
                            max_tile_rows=2048)
    ref5 = jnp.mean((p5 - t5) ** 2) * 1.25
    assert jnp.allclose(got5, ref5, rtol=1e-4, atol=1e-6), (got5, ref5)

    # Default threshold: small inputs take the plain-XLA fast path.
    got6 = wrapped_mse_loss(pred, target, 3.0)
    ref6 = jnp.mean((pred - target) ** 2) * 3.0
    assert jnp.allclose(got6, ref6, rtol=1e-5, atol=1e-6), (got6, ref6)

    jax.block_until_ready((got2, got2b, got3, got4, got5, got6))
    print("KERNEL_OK")
</pallas_src>

<mosaic_0001>
module attributes {stable_mosaic.version = 11 : i64} {
  func.func @_sq_diff_sum_kernel(%arg0: i32, %arg1: i32, %arg2: memref<16x128xf32, #tpu.memory_space<vmem>>, %arg3: memref<16x128xf32, #tpu.memory_space<vmem>>, %arg4: memref<8x128xf32, #tpu.memory_space<vmem>>, %arg5: memref<8x128xf32, #tpu.memory_space<vmem>>) attributes {dimension_semantics = [#tpu.dimension_semantics<parallel>, #tpu.dimension_semantics<arbitrary>], iteration_bounds = array<i64: 1, 1>, scalar_prefetch = 0 : i64, scratch_operands = 1 : i64, tpu.core_type = #tpu.core_type<tc>, window_params = [{transform_indices = @transform_0, window_bounds = array<i64: 16, 128>}, {transform_indices = @transform_1, window_bounds = array<i64: 16, 128>}, {transform_indices = @transform_2, window_bounds = array<i64: 8, 128>}]} {
    %c0_i32 = arith.constant 0 : i32
    %0 = arith.cmpi eq, %arg1, %c0_i32 : i32
    %1 = arith.extui %0 : i1 to i32
    %c0_i32_0 = arith.constant 0 : i32
    %2 = arith.cmpi ne, %1, %c0_i32_0 : i32
    scf.if %2 {
      %cst_10 = arith.constant 0.000000e+00 : f32
      %15 = vector.broadcast %cst_10 : f32 to vector<8x128xf32>
      %c0_11 = arith.constant 0 : index
      %c0_12 = arith.constant 0 : index
      %16 = vector.load %arg5[%c0_11, %c0_12] : memref<8x128xf32, #tpu.memory_space<vmem>>, vector<8x128xf32>
      tpu.vector_store %arg5[%c0_11, %c0_12], %15 {strides = array<i32>} : memref<8x128xf32, #tpu.memory_space<vmem>>, vector<8x128xf32>,
    } else {
    }
    %c0 = arith.constant 0 : index
    %c0_1 = arith.constant 0 : index
    %3 = vector.load %arg2[%c0, %c0_1] : memref<16x128xf32, #tpu.memory_space<vmem>>, vector<16x128xf32>
    %c0_2 = arith.constant 0 : index
    %c0_3 = arith.constant 0 : index
    %4 = vector.load %arg3[%c0_2, %c0_3] : memref<16x128xf32, #tpu.memory_space<vmem>>, vector<16x128xf32>
    %5 = arith.subf %3, %4 : vector<16x128xf32>
    %6 = arith.mulf %5, %5 : vector<16x128xf32>
    %c0_4 = arith.constant 0 : index
    %c0_5 = arith.constant 0 : index
    %7 = vector.load %arg5[%c0_4, %c0_5] : memref<8x128xf32, #tpu.memory_space<vmem>>, vector<8x128xf32>
    %8 = vector.shape_cast %6 : vector<16x128xf32> to vector<2x8x128xf32>
    %cst = arith.constant dense<0.000000e+00> : vector<8x128xf32>
    %9 = vector.multi_reduction <add>, %8, %cst [0] : vector<2x8x128xf32> to vector<8x128xf32>
    %10 = arith.addf %7, %9 : vector<8x128xf32>
    %c0_6 = arith.constant 0 : index
    %c0_7 = arith.constant 0 : index
    %11 = vector.load %arg5[%c0_6, %c0_7] : memref<8x128xf32, #tpu.memory_space<vmem>>, vector<8x128xf32>
    tpu.vector_store %arg5[%c0_6, %c0_7], %10 {strides = array<i32>} : memref<8x128xf32, #tpu.memory_space<vmem>>, vector<8x128xf32>,
    %c0_i32_8 = arith.constant 0 : i32
    %12 = arith.cmpi eq, %arg1, %c0_i32_8 : i32
    %13 = arith.extui %12 : i1 to i32
    %c0_i32_9 = arith.constant 0 : i32
    %14 = arith.cmpi ne, %13, %c0_i32_9 : i32
    scf.if %14 {
      %c0_10 = arith.constant 0 : index
      %c0_11 = arith.constant 0 : index
      %15 = vector.load %arg5[%c0_10, %c0_11] : memref<8x128xf32, #tpu.memory_space<vmem>>, vector<8x128xf32>
      %c0_12 = arith.constant 0 : index
      %c0_13 = arith.constant 0 : index
      %16 = vector.load %arg4[%c0_12, %c0_13] : memref<8x128xf32, #tpu.memory_space<vmem>>, vector<8x128xf32>
      tpu.vector_store %arg4[%c0_12, %c0_13], %15 {strides = array<i32>} : memref<8x128xf32, #tpu.memory_space<vmem>>, vector<8x128xf32>,
    } else {
    }
    return
  }
  func.func @transform_0(%arg0: i32, %arg1: i32) -> (i32, i32) {
    %c1_i32 = arith.constant 1 : i32
    %0 = arith.muli %arg0, %c1_i32 : i32
    %1 = arith.addi %0, %arg1 : i32
    %c0_i32 = arith.constant 0 : i32
    %c0_i32_0 = arith.constant 0 : i32
    return %1, %c0_i32 : i32, i32
  }
  func.func @transform_1(%arg0: i32, %arg1: i32) -> (i32, i32) {
    %c1_i32 = arith.constant 1 : i32
    %0 = arith.muli %arg0, %c1_i32 : i32
    %1 = arith.addi %0, %arg1 : i32
    %c0_i32 = arith.constant 0 : i32
    %c0_i32_0 = arith.constant 0 : i32
    return %1, %c0_i32 : i32, i32
  }
  func.func @transform_2(%arg0: i32, %arg1: i32) -> (i32, i32) {
    %c0_i32 = arith.constant 0 : i32
    %c0_i32_0 = arith.constant 0 : i32
    return %arg0, %c0_i32 : i32, i32
  }
}

</mosaic_0001>

<bundles_post_ra>
// kernel: loss_fn.1
= control target key start
LH: loop header
LB: loop body
LE: loop exit
PB: predicated region body
PF: predicated region fallthrough
CT: control target
= control target key end

     0   :  { %s123_s0 = inlined_call_operand.vmem [shape: f32[16,128], index: 0, kind: input, shape index: {}]   ;;  %s124_s1 = inlined_call_operand.vmem [shape: f32[16,128], index: 1, kind: input, shape index: {}]   ;;  %s125_s2 = inlined_call_operand.vmem [shape: f32[8,128], index: 2, kind: output, shape index: {}]  }
   0x1   :  { %v60_v0 = vld [vmem:[%s123_s0] sm:$0xff]  ;;  %v61_v1 = vld [vmem:[%s123_s0 + $0x8] sm:$0xff] }
   0x2   :  { %v62_v2 = vld [vmem:[%s124_s1] sm:$0xff]  ;;  %v63_v3 = vld [vmem:[%s124_s1 + $0x8] sm:$0xff] }
   0x3   :  { %v64_v4 = vsub.f32 %v60_v0, %v62_v2  ;;  %v65_v5 = vsub.f32 %v61_v1, %v63_v3 }
   0x5   :  { %v66_v6 = vmul.f32 %v64_v4, %v64_v4  ;;  %v67_v7 = vmul.f32 %v65_v5, %v65_v5 }
   0x7   :  { %v69_v8 = vadd.f32 %v67_v7, %v66_v6 }
   0x9   :  { %76 = vst [vmem:[%s125_s2] sm:$0xff] %v69_v8 }

</bundles_post_ra>
